<compile_context>
chip_gen: v7x
topology: tpu7x:2x2x1
jax: 0.10.0
libtpu: 0.0.40
codegen_flags: <defaults>
</compile_context>

<pallas_src>
import math

import jax
import jax.numpy as jnp
from jax.experimental import pallas as pl
from jax.experimental.pallas import tpu as pltpu

Z_DIM = 10
H1 = 20
H2 = 150
OUT = 784        # 1 * 28 * 28
TB_MAX = 1024    # max batch-tile rows per grid step


def _round_up(x, m):
    return (x + m - 1) // m * m


def generator_kernel(x_ref, w1_ref, b1_ref, w2_ref, b2_ref, w3_ref, b3_ref,
                     o_ref):
    # fc1 + relu   (bf16 MXU inputs, f32 accumulation, f32 bias/activation)
    x = x_ref[...].astype(jnp.bfloat16)
    h1 = jnp.dot(x, w1_ref[...], preferred_element_type=jnp.float32) + b1_ref[...]
    h1 = jnp.maximum(h1, 0.0).astype(jnp.bfloat16)
    # fc2 + relu
    h2 = jnp.dot(h1, w2_ref[...], preferred_element_type=jnp.float32) + b2_ref[...]
    h2 = jnp.maximum(h2, 0.0).astype(jnp.bfloat16)
    # fc3 + sigmoid: exp on EUP, approx reciprocal on EUP (epilogue off VALU)
    logits = jnp.dot(h2, w3_ref[...], preferred_element_type=jnp.float32) + b3_ref[...]
    o_ref[...] = pl.reciprocal(1.0 + jnp.exp(-logits), approx=True)


def prepare_params(params):
    """One-time parameter prep: bf16 weights for the MXU, f32 biases.

    Call once (outside the per-step forward) so no pad/cast XLA ops run per call.
    """
    w1, b1, w2, b2, w3, b3 = params
    return (w1.astype(jnp.bfloat16), b1,
            w2.astype(jnp.bfloat16), b2,
            w3.astype(jnp.bfloat16), b3)


def generator_forward(x, prep_params, *, tb=None):
    """x: (B, Z_DIM) float32 -> (B, 1, 28, 28) float32.

    prep_params: output of prepare_params().
    """
    w1, b1, w2, b2, w3, b3 = prep_params
    B = x.shape[0]

    # Pad the batch only to a multiple of 8 (sublane); tile-granularity padding
    # is handled by masked tail blocks via a cdiv grid, not by padding rows.
    b8 = _round_up(B, 8)
    if b8 != B:
        x = jnp.pad(x, ((0, b8 - B), (0, 0)))

    if tb is None:
        # >= 2 grid steps (when the batch allows) so v7x megacore shards the
        # batch across both TensorCores; tile capped at TB_MAX rows.
        n_steps = max(pl.cdiv(b8, TB_MAX), 2 if b8 >= 16 else 1)
        tb = _round_up(pl.cdiv(b8, n_steps), 8)
    grid = (pl.cdiv(b8, tb),)

    flops = 2 * b8 * (Z_DIM * H1 + H1 * H2 + H2 * OUT)
    bytes_accessed = (4 * b8 * (Z_DIM + OUT)                    # x in + f32 out
                      + 2 * (Z_DIM * H1 + H1 * H2 + H2 * OUT)   # bf16 weights
                      + 4 * (H1 + H2 + OUT))                    # f32 biases

    const = lambda i: (0, 0)   # weights/biases: same block every step (resident)
    out = pl.pallas_call(
        generator_kernel,
        out_shape=jax.ShapeDtypeStruct((b8, OUT), jnp.float32),
        grid=grid,
        in_specs=[
            pl.BlockSpec((tb, Z_DIM), lambda i: (i, 0)),
            pl.BlockSpec((Z_DIM, H1), const),
            pl.BlockSpec((1, H1), const),
            pl.BlockSpec((H1, H2), const),
            pl.BlockSpec((1, H2), const),
            pl.BlockSpec((H2, OUT), const),
            pl.BlockSpec((1, OUT), const),
        ],
        out_specs=pl.BlockSpec((tb, OUT), lambda i: (i, 0)),
        compiler_params=pltpu.CompilerParams(
            dimension_semantics=("parallel",),
            vmem_limit_bytes=32 * 1024 * 1024),
        cost_estimate=pl.CostEstimate(
            flops=flops,
            transcendentals=b8 * OUT,
            bytes_accessed=bytes_accessed),
    )(x, w1, b1, w2, b2, w3, b3)

    if b8 != B:
        out = out[:B]
    # 784 = 1*28*28, so this matches PyTorch's view(-1, 1, 28, 28) and is a
    # copy-free reshape of the kernel's contiguous output.
    return out.reshape(B, 1, 28, 28)


def init_params(key):
    """Deterministic init mimicking nn.Linear default U(-1/sqrt(fan_in), +)."""
    ks = jax.random.split(key, 6)

    def linear(kw, kb, fan_in, fan_out):
        bound = 1.0 / math.sqrt(fan_in)
        # stored transposed relative to PyTorch: (in, out)
        w = jax.random.uniform(kw, (fan_in, fan_out), jnp.float32, -bound, bound)
        b = jax.random.uniform(kb, (1, fan_out), jnp.float32, -bound, bound)
        return w, b

    w1, b1 = linear(ks[0], ks[1], Z_DIM, H1)
    w2, b2 = linear(ks[2], ks[3], H1, H2)
    w3, b3 = linear(ks[4], ks[5], H2, OUT)
    return (w1, b1, w2, b2, w3, b3)


def reference_forward(x, params):
    # Pure f32 reference matching the PyTorch module semantics.
    w1, b1, w2, b2, w3, b3 = params
    h = jnp.maximum(x @ w1 + b1, 0.0)
    h = jnp.maximum(h @ w2 + b2, 0.0)
    y = jax.nn.sigmoid(h @ w3 + b3)
    return y.reshape(-1, 1, 28, 28)


if __name__ == "__main__":
    key = jax.random.PRNGKey(0)
    k_params, k_x1, k_x2 = jax.random.split(key, 3)

    params = init_params(k_params)
    gparams = prepare_params(params)   # one-time bf16 weight prep

    # Small batch (single grid step).
    B1 = 8
    x1 = jax.random.normal(k_x1, (B1, Z_DIM), jnp.float32)
    out1 = jax.block_until_ready(generator_forward(x1, gparams))
    assert out1.shape == (B1, 1, 28, 28), out1.shape
    ref1 = reference_forward(x1, params)
    err1 = float(jnp.max(jnp.abs(out1 - ref1)))
    # bf16 matmul inputs + approx-reciprocal sigmoid -> bf16-scale tolerance.
    assert jnp.allclose(out1, ref1, atol=2e-2, rtol=2e-2), err1

    # Batch that exercises row padding (to 8), a 2-step grid, and a masked
    # uneven tail block.
    B2 = 20
    x2 = jax.random.normal(k_x2, (B2, Z_DIM), jnp.float32)
    out2 = jax.block_until_ready(generator_forward(x2, gparams))
    assert out2.shape == (B2, 1, 28, 28), out2.shape
    ref2 = reference_forward(x2, params)
    err2 = float(jnp.max(jnp.abs(out2 - ref2)))
    assert jnp.allclose(out2, ref2, atol=2e-2, rtol=2e-2), err2

    print("KERNEL_OK")
</pallas_src>

<mosaic_0001>
module attributes {stable_mosaic.version = 11 : i64} {
  func.func @generator_kernel(%arg0: i32, %arg1: memref<8x10xf32, #tpu.memory_space<vmem>>, %arg2: memref<10x20xbf16, #tpu.memory_space<vmem>>, %arg3: memref<1x20xf32, #tpu.memory_space<vmem>>, %arg4: memref<20x150xbf16, #tpu.memory_space<vmem>>, %arg5: memref<1x150xf32, #tpu.memory_space<vmem>>, %arg6: memref<150x784xbf16, #tpu.memory_space<vmem>>, %arg7: memref<1x784xf32, #tpu.memory_space<vmem>>, %arg8: memref<8x784xf32, #tpu.memory_space<vmem>>) attributes {dimension_semantics = [#tpu.dimension_semantics<parallel>], iteration_bounds = array<i64: 1>, scalar_prefetch = 0 : i64, scratch_operands = 0 : i64, tpu.core_type = #tpu.core_type<tc>, window_params = [{transform_indices = @transform_0, window_bounds = array<i64: 8, 10>}, {pipeline_mode = #tpu.pipeline_mode<synchronous>, transform_indices = @transform_1, window_bounds = array<i64: 10, 20>}, {pipeline_mode = #tpu.pipeline_mode<synchronous>, transform_indices = @transform_2, window_bounds = array<i64: 1, 20>}, {pipeline_mode = #tpu.pipeline_mode<synchronous>, transform_indices = @transform_3, window_bounds = array<i64: 20, 150>}, {pipeline_mode = #tpu.pipeline_mode<synchronous>, transform_indices = @transform_4, window_bounds = array<i64: 1, 150>}, {pipeline_mode = #tpu.pipeline_mode<synchronous>, transform_indices = @transform_5, window_bounds = array<i64: 150, 784>}, {pipeline_mode = #tpu.pipeline_mode<synchronous>, transform_indices = @transform_6, window_bounds = array<i64: 1, 784>}, {transform_indices = @transform_7, window_bounds = array<i64: 8, 784>}]} {
    %c0 = arith.constant 0 : index
    %c0_0 = arith.constant 0 : index
    %0 = vector.load %arg1[%c0, %c0_0] : memref<8x10xf32, #tpu.memory_space<vmem>>, vector<8x10xf32>
    %1 = arith.truncf %0 : vector<8x10xf32> to vector<8x10xbf16>
    %c0_1 = arith.constant 0 : index
    %c0_2 = arith.constant 0 : index
    %2 = vector.load %arg2[%c0_1, %c0_2] : memref<10x20xbf16, #tpu.memory_space<vmem>>, vector<10x20xbf16>
    %cst = arith.constant dense<0.000000e+00> : vector<8x20xf32>
    %3 = tpu.matmul %1, %2, %cst {dimension_numbers = #tpu.dot_dimension_numbers<[1], [0], [0], [1], [0, 0, 1, 1], [], []>} : vector<8x10xbf16>, vector<10x20xbf16>, vector<8x20xf32> -> vector<8x20xf32>
    %c0_3 = arith.constant 0 : index
    %c0_4 = arith.constant 0 : index
    %4 = vector.load %arg3[%c0_3, %c0_4] : memref<1x20xf32, #tpu.memory_space<vmem>>, vector<1x20xf32>
    %5 = vector.broadcast %4 : vector<1x20xf32> to vector<8x20xf32>
    %6 = arith.addf %3, %5 : vector<8x20xf32>
    %cst_5 = arith.constant 0.000000e+00 : f32
    %7 = vector.broadcast %cst_5 : f32 to vector<8x20xf32>
    %8 = arith.maximumf %6, %7 : vector<8x20xf32>
    %9 = arith.truncf %8 : vector<8x20xf32> to vector<8x20xbf16>
    %c0_6 = arith.constant 0 : index
    %c0_7 = arith.constant 0 : index
    %10 = vector.load %arg4[%c0_6, %c0_7] : memref<20x150xbf16, #tpu.memory_space<vmem>>, vector<20x150xbf16>
    %cst_8 = arith.constant dense<0.000000e+00> : vector<8x150xf32>
    %11 = tpu.matmul %9, %10, %cst_8 {dimension_numbers = #tpu.dot_dimension_numbers<[1], [0], [0], [1], [0, 0, 1, 1], [], []>} : vector<8x20xbf16>, vector<20x150xbf16>, vector<8x150xf32> -> vector<8x150xf32>
    %c0_9 = arith.constant 0 : index
    %c0_10 = arith.constant 0 : index
    %12 = vector.load %arg5[%c0_9, %c0_10] : memref<1x150xf32, #tpu.memory_space<vmem>>, vector<1x150xf32>
    %13 = vector.broadcast %12 : vector<1x150xf32> to vector<8x150xf32>
    %14 = arith.addf %11, %13 : vector<8x150xf32>
    %cst_11 = arith.constant 0.000000e+00 : f32
    %15 = vector.broadcast %cst_11 : f32 to vector<8x150xf32>
    %16 = arith.maximumf %14, %15 : vector<8x150xf32>
    %17 = arith.truncf %16 : vector<8x150xf32> to vector<8x150xbf16>
    %c0_12 = arith.constant 0 : index
    %c0_13 = arith.constant 0 : index
    %18 = vector.load %arg6[%c0_12, %c0_13] : memref<150x784xbf16, #tpu.memory_space<vmem>>, vector<150x784xbf16>
    %cst_14 = arith.constant dense<0.000000e+00> : vector<8x784xf32>
    %19 = tpu.matmul %17, %18, %cst_14 {dimension_numbers = #tpu.dot_dimension_numbers<[1], [0], [0], [1], [0, 0, 1, 1], [], []>} : vector<8x150xbf16>, vector<150x784xbf16>, vector<8x784xf32> -> vector<8x784xf32>
    %c0_15 = arith.constant 0 : index
    %c0_16 = arith.constant 0 : index
    %20 = vector.load %arg7[%c0_15, %c0_16] : memref<1x784xf32, #tpu.memory_space<vmem>>, vector<1x784xf32>
    %21 = vector.broadcast %20 : vector<1x784xf32> to vector<8x784xf32>
    %22 = arith.addf %19, %21 : vector<8x784xf32>
    %cst_17 = arith.constant 0.000000e+00 : f32
    %23 = vector.broadcast %cst_17 : f32 to vector<8x784xf32>
    %24 = arith.subf %23, %22 : vector<8x784xf32>
    %25 = math.exp %24 : vector<8x784xf32>
    %cst_18 = arith.constant 1.000000e+00 : f32
    %26 = vector.broadcast %cst_18 : f32 to vector<8x784xf32>
    %27 = arith.addf %26, %25 : vector<8x784xf32>
    %28 = tpu.reciprocal %27 {approx = true} : vector<8x784xf32> -> vector<8x784xf32>
    %c0_19 = arith.constant 0 : index
    %c0_20 = arith.constant 0 : index
    %29 = vector.load %arg8[%c0_19, %c0_20] : memref<8x784xf32, #tpu.memory_space<vmem>>, vector<8x784xf32>
    tpu.vector_store %arg8[%c0_19, %c0_20], %28 {strides = array<i32>} : memref<8x784xf32, #tpu.memory_space<vmem>>, vector<8x784xf32>,
    return
  }
  func.func @transform_0(%arg0: i32) -> (i32, i32) {
    %c0_i32 = arith.constant 0 : i32
    %c0_i32_0 = arith.constant 0 : i32
    return %arg0, %c0_i32 : i32, i32
  }
  func.func @transform_1(%arg0: i32) -> (i32, i32) {
    %c0_i32 = arith.constant 0 : i32
    %c0_i32_0 = arith.constant 0 : i32
    %c0_i32_1 = arith.constant 0 : i32
    return %c0_i32, %c0_i32_0 : i32, i32
  }
  func.func @transform_2(%arg0: i32) -> (i32, i32) {
    %c0_i32 = arith.constant 0 : i32
    %c0_i32_0 = arith.constant 0 : i32
    %c0_i32_1 = arith.constant 0 : i32
    return %c0_i32, %c0_i32_0 : i32, i32
  }
  func.func @transform_3(%arg0: i32) -> (i32, i32) {
    %c0_i32 = arith.constant 0 : i32
    %c0_i32_0 = arith.constant 0 : i32
    %c0_i32_1 = arith.constant 0 : i32
    return %c0_i32, %c0_i32_0 : i32, i32
  }
  func.func @transform_4(%arg0: i32) -> (i32, i32) {
    %c0_i32 = arith.constant 0 : i32
    %c0_i32_0 = arith.constant 0 : i32
    %c0_i32_1 = arith.constant 0 : i32
    return %c0_i32, %c0_i32_0 : i32, i32
  }
  func.func @transform_5(%arg0: i32) -> (i32, i32) {
    %c0_i32 = arith.constant 0 : i32
    %c0_i32_0 = arith.constant 0 : i32
    %c0_i32_1 = arith.constant 0 : i32
    return %c0_i32, %c0_i32_0 : i32, i32
  }
  func.func @transform_6(%arg0: i32) -> (i32, i32) {
    %c0_i32 = arith.constant 0 : i32
    %c0_i32_0 = arith.constant 0 : i32
    %c0_i32_1 = arith.constant 0 : i32
    return %c0_i32, %c0_i32_0 : i32, i32
  }
  func.func @transform_7(%arg0: i32) -> (i32, i32) {
    %c0_i32 = arith.constant 0 : i32
    %c0_i32_0 = arith.constant 0 : i32
    return %arg0, %c0_i32 : i32, i32
  }
}

</mosaic_0001>

<bundles_post_ra>
// kernel: tpu_custom_call.1
= control target key start
LH: loop header
LB: loop body
LE: loop exit
PB: predicated region body
PF: predicated region fallthrough
CT: control target
= control target key end

     0   :  { %12 = vsyncpa [#allocation3], 0  ;;  %s1458_s0 = inlined_call_operand.hbm [shape: f32[8,10], index: 0, kind: input, shape index: {}]   ;;  %s1459_s1 = inlined_call_operand.hbm [shape: bf16[10,20], index: 1, kind: input, shape index: {}]   ;;  %s1460_s2 = inlined_call_operand.vmem [shape: f32[1,20], index: 2, kind: input, shape index: {}]   ;;  %s1461_s3 = inlined_call_operand.hbm [shape: bf16[20,150], index: 3, kind: input, shape index: {}]   ;;  %s1462_s4 = inlined_call_operand.vmem [shape: f32[1,150], index: 4, kind: input, shape index: {}]   ;;  %s1463_s5 = inlined_call_operand.hbm [shape: bf16[150,784], index: 5, kind: input, shape index: {}]   ;;  %s1464_s6 = inlined_call_operand.vmem [shape: f32[1,784], index: 6, kind: input, shape index: {}]   ;;  %s1465_s7 = inlined_call_operand.hbm [shape: f32[8,784], index: 7, kind: output, shape index: {}]  }
   0x1   :  { %13 = vsyncpa [#allocation6], 0 }
   0x2   :  { %14 = vsyncpa [#allocation9], 0 }
   0x3   :  { %15 = vsyncpa [#allocation4], 0  ;;  %s1294_s24 = smov [#allocation5]   ;;  %s1176_s28 = scalar_lea.hbm %s1459_s1, 128 }
   0x4   :  { %s31_s25 = sshll.u32 %s1294_s24, 4  ;;  %p1177_p0 = scmp.ne.s32.totalorder %s1459_s1, %s1176_s28  ;;  %s32_s25 = int_to_ptr.vmem [resolvable:$true] %s31_s25 }
   0x5   :  { %p1180_p1 = scmp.lt.u32.totalorder %s1176_s28, %s1459_s1 }
   0x7   :  { %p1182_p2 = pnand %p1180_p1, %p1177_p0 }
   0x9   :  { %1185 = shalt.err (!%p1182_p2)
}
   0xa   :  { %s1186_s10 = scalar_lea.vmem %s32_s25, 128  ;;  %p1191_p4 = scmp.lt.s32.totalorder %s32_s25, %s32_s25 }
   0xb   :  { %p1187_p3 = scmp.ne.s32.totalorder %s32_s25, %s1186_s10  ;;  %p1192_p5 = scmp.lt.s32.totalorder %s1186_s10, %s1186_s10 }
   0xd   :  { %p1193_p6 = por %p1192_p5, %p1191_p4 }
   0xf   :  { %p1194_p7 = pnand %p1193_p6, %p1187_p3 }
  0x11   :  { %1197 = shalt.err (!%p1194_p7)
}
  0x12   :  { %s1295_s11 = smov 64   ;;  %s1296_s12 = smov 4  }
  0x13   :  { %37 = dma.hbm_to_vmem [thread:$0]  %s1459_s1, 128, %s32_s25, [#allocation6], %s1295_s11, %s1295_s11, %s1296_s12  }
  0x14   :  { %s1297_s15 = smov [#allocation2]   ;;  %s1298_s17 = smov [#allocation7]  }
  0x15   :  { %s22_s16 = sshll.u32 %s1297_s15, 4  ;;  %s45_s18 = sshll.u32 %s1298_s17, 4  ;;  %s23_s16 = int_to_ptr.vmem [resolvable:$true] %s22_s16  ;;  %s46_s18 = int_to_ptr.vmem [resolvable:$true] %s45_s18 }
  0x16   :  { %s1198_s21 = scalar_lea.hbm %s1458_s0, 128 }
  0x17   :  { %p1199_p8 = scmp.ne.s32.totalorder %s1458_s0, %s1198_s21  ;;  %p1202_p9 = scmp.lt.u32.totalorder %s1198_s21, %s1458_s0 }
  0x19   :  { %p1204_p10 = pnand %p1202_p9, %p1199_p8 }
  0x1b   :  { %1207 = shalt.err (!%p1204_p10)
}
  0x1c   :  { %s1208_s1 = scalar_lea.vmem %s23_s16, 128  ;;  %p1213_p12 = scmp.lt.s32.totalorder %s23_s16, %s23_s16 }
  0x1d   :  { %p1209_p11 = scmp.ne.s32.totalorder %s23_s16, %s1208_s1  ;;  %p1214_p13 = scmp.lt.s32.totalorder %s1208_s1, %s1208_s1 }
  0x1f   :  { %p1215_p0 = por %p1214_p13, %p1213_p12 }
  0x21   :  { %p1216_p1 = pnand %p1215_p0, %p1209_p11 }
  0x23   :  { %1219 = shalt.err (!%p1216_p1)
}
  0x24   :  { %25 = dma.hbm_to_vmem [thread:$0]  %s1458_s0, 128, %s23_s16, [#allocation3]  }
  0x25   :  { %s1220_s30 = scalar_lea.hbm %s1461_s3, 384 }
  0x26   :  { %p1221_p2 = scmp.ne.s32.totalorder %s1461_s3, %s1220_s30  ;;  %p1224_p3 = scmp.lt.u32.totalorder %s1220_s30, %s1461_s3 }
  0x28   :  { %p1226_p4 = pnand %p1224_p3, %p1221_p2 }
  0x2a   :  { %1229 = shalt.err (!%p1226_p4)
}
  0x2b   :  { %s1230_s12 = scalar_lea.vmem %s46_s18, 384  ;;  %p1235_p6 = scmp.lt.s32.totalorder %s46_s18, %s46_s18 }
  0x2c   :  { %p1231_p5 = scmp.ne.s32.totalorder %s46_s18, %s1230_s12  ;;  %p1236_p7 = scmp.lt.s32.totalorder %s1230_s12, %s1230_s12 }
  0x2e   :  { %p1237_p8 = por %p1236_p7, %p1235_p6 }
  0x30   :  { %p1238_p9 = pnand %p1237_p8, %p1231_p5 }
  0x32   :  { %1241 = shalt.err (!%p1238_p9)
}
  0x33   :  { %s1299_s0 = smov 128   ;;  %s1300_s13 = smov 8  }
  0x34   :  { %51 = dma.hbm_to_vmem [thread:$0]  %s1461_s3, 384, %s46_s18, [#allocation6], %s1299_s0, %s1299_s0, %s1300_s13  }
  0x35   :  { %s1301_s16 = smov [#allocation8]   ;;  %s1242_s21 = scalar_lea.hbm %s1463_s5, 8512 }
  0x36   :  { %s59_s17 = sshll.u32 %s1301_s16, 4  ;;  %p1243_p10 = scmp.ne.s32.totalorder %s1463_s5, %s1242_s21  ;;  %s60_s17 = int_to_ptr.vmem [resolvable:$true] %s59_s17 }
  0x37   :  { %p1246_p11 = scmp.lt.u32.totalorder %s1242_s21, %s1463_s5 }
  0x39   :  { %p1248_p12 = pnand %p1246_p11, %p1243_p10 }
  0x3b   :  { %1251 = shalt.err (!%p1248_p12)
}
  0x3c   :  { %s1252_s1 = scalar_lea.vmem %s60_s17, 8512  ;;  %p1257_p0 = scmp.lt.s32.totalorder %s60_s17, %s60_s17 }
  0x3d   :  { %p1253_p13 = scmp.ne.s32.totalorder %s60_s17, %s1252_s1  ;;  %p1258_p1 = scmp.lt.s32.totalorder %s1252_s1, %s1252_s1 }
  0x3f   :  { %p1259_p2 = por %p1258_p1, %p1257_p0 }
  0x41   :  { %p1260_p3 = pnand %p1259_p2, %p1253_p13 }
  0x43   :  { %1263 = shalt.err (!%p1260_p3)
}
  0x44   :  { %s1302_s3 = smov 448   ;;  %s1303_s18 = smov 28  }
  0x45   :  { %65 = dma.hbm_to_vmem [thread:$0]  %s1463_s5, 8512, %s60_s17, [#allocation9], %s1302_s3, %s1302_s3, %s1303_s18  }
  0x46   :  { %1286 = dma.done.wait [#allocation3], 128  }
  0x47   :  { %1287 = vsyncadd [#allocation3], 4294967168 }
  0x48   :  { %1288 = dma.done.wait [#allocation6], 512  }
  0x49   :  { %1289 = vsyncadd [#allocation6], 4294966784 }
  0x4a   :  { %1290 = dma.done.wait [#allocation9], 8512  }
  0x4b   :  { %1291 = vsyncadd [#allocation9], 4294958784  ;;  %v1304_v0 = vmov 0.0   ;;  %vm1305_vm0 = vmmov 0   ;;  %vm101_vm1 = vcmask 1044480   ;;  %v81_v2 = vld [vmem:[#allocation2] sm:$0xff] }
  0x4c   :  { %1025 = vmatprep.subr.bf16.mxu0 %v1304_v0  ;;  %1027 = vmatprep.mubr.msk.bf16.mxu0 %vm1305_vm0, %v1304_v0  ;;  %v1045_v1 = vld [vmem:[#allocation5] sm:$0x1f]   ;;  %v82_v4 = vpack.c.bf16 %v81_v2, %v81_v2  ;;  %v1046_v5 = vld [vmem:[#allocation7 + $0x4] ss:$8 sps:$4 sm:$0xff]   ;;  %vm97_vm2 = vcmask 80896   ;;  %vm181_vm3 = vcmask 1041408  }
  0x4d   :  { %v103_v3 = vsel %vm101_vm1, %v1045_v1, 0  ;;  %188 = vmatprep.subr.bf16.mxu1 %v1046_v5  ;;  %v1048_v6 = vld [vmem:[#allocation7] ss:$8 sps:$4 sm:$0xff]   ;;  %v149_v7 = vld [vmem:[#allocation7 + $0x10] sm:$0x33]  ;;  %v1306_v11 = vmov 0   ;;  %v152_v1 = vlaneseq }
  0x4e   :  { %1026 = vmatpush3.bf16.msra.mxu0 %v103_v3  ;;  %189 = vmatpush1.bf16.msra.mxu1 %v1048_v6  ;;  %v943_v8 = vcombine.high %v149_v7, %v149_v7  ;;  %v942_v9 = vcombine.low %v149_v7, %v149_v7  ;;  %v1051_v12 = vld [vmem:[#allocation8] ss:$28 sps:$4 sm:$0xff]   ;;  %v1056_v14 = vld [vmem:[#allocation8 + $0xc] ss:$28 sps:$4 sm:$0xff]   ;;  %v1057_v16 = vld [vmem:[#allocation8 + $0x38] ss:$28 sps:$4 sm:$0xff]  }
  0x4f   :  { %220 = vmatprep.mubr.bf16.mxu1 %v1306_v11  ;;  %v1053_v13 = vld [vmem:[#allocation8 + $0x4] ss:$28 sps:$4 sm:$0xff]   ;;  %v1059_v15 = vld [vmem:[#allocation8 + $0x3c] ss:$28 sps:$4 sm:$0xff]   ;;  %v1065_v17 = vld [vmem:[#allocation8 + $0x74] ss:$28 sps:$4 sm:$0xff]  }
  0x50   :  { %944 = vmatprep.subr.msk.bf16.mxu1 %vm181_vm3, %v943_v8  ;;  %v183_v10 = vsel %vm181_vm3, %v942_v9, 0  ;;  %714 = vmatprep.subr.bf16.mxu0 %v1053_v13  ;;  %v1063_v18 = vld [vmem:[#allocation8 + $0x70] ss:$28 sps:$4 sm:$0xff]   ;;  %v1069_v20 = vld [vmem:[#allocation8 + $0xa8] ss:$28 sps:$4 sm:$0xff]   ;;  %vm177_vm4 = vcmask 162816  }
  0x51   :  { %1028 = vmatmul.mubr.msk.bf16.vlgmr.msra.gmra.mrb[0].mxu0 %vm97_vm2, %v82_v4  ;;  %v1071_v19 = vld [vmem:[#allocation8 + $0xac] ss:$28 sps:$4 sm:$0xff]   ;;  %v1077_v21 = vld [vmem:[#allocation8 + $0xe4] ss:$28 sps:$4 sm:$0xff]   ;;  %v1083_v23 = vld [vmem:[#allocation8 + $0x11c] ss:$28 sps:$4 sm:$0xff]  }
  0x52   :  { %191 = vmatpush1.bf16.msra.mxu1 %v183_v10  ;;  %715 = vmatpush1.bf16.msra.mxu0 %v1051_v12  ;;  %v1075_v22 = vld [vmem:[#allocation8 + $0xe0] ss:$28 sps:$4 sm:$0xff]   ;;  %v1081_v24 = vld [vmem:[#allocation8 + $0x118] ss:$28 sps:$4 sm:$0xff]   ;;  %v1087_v26 = vld [vmem:[#allocation8 + $0x150] ss:$28 sps:$4 sm:$0xff]  }
  0x53   :  { %755 = vmatprep.subr.bf16.mxu1 %v1056_v14  ;;  %716 = vmatprep.subr.bf16.mxu0 %v1059_v15  ;;  %v1089_v25 = vld [vmem:[#allocation8 + $0x154] ss:$28 sps:$4 sm:$0xff]   ;;  %v1095_v27 = vld [vmem:[#allocation8 + $0x18c] ss:$28 sps:$4 sm:$0xff]   ;;  %v937_v29 = vld [vmem:[%s1460_s2] ss:$0 sm:$0xff] }
  0x54   :  { %v1093_v28 = vld [vmem:[#allocation8 + $0x188] ss:$28 sps:$4 sm:$0xff]   ;;  %v1060_v39 = vld [vmem:[#allocation8 + $0x40] ss:$28 sps:$4 sm:$0xff]   ;;  %v1066_v41 = vld [vmem:[#allocation8 + $0x78] ss:$28 sps:$4 sm:$0xff]  }
  0x55   :  { %v1054_v36 = vld [vmem:[#allocation8 + $0x8] ss:$28 sps:$4 sm:$0xff]   ;;  %v1068_v40 = vld [vmem:[#allocation8 + $0x7c] ss:$28 sps:$4 sm:$0xff]   ;;  %v1074_v42 = vld [vmem:[#allocation8 + $0xb4] ss:$28 sps:$4 sm:$0xff]  }
  0x56   :  { %717 = vmatpush1.bf16.msra.mxu0 %v1057_v16  ;;  %v1062_v38 = vld [vmem:[#allocation8 + $0x44] ss:$28 sps:$4 sm:$0xff]   ;;  %v1072_v43 = vld [vmem:[#allocation8 + $0xb0] ss:$28 sps:$4 sm:$0xff]   ;;  %v1092_v48 = vld [vmem:[#allocation8 + $0x15c] ss:$28 sps:$4 sm:$0xff]  }
  0x57   :  { %718 = vmatprep.subr.bf16.mxu0 %v1065_v17  ;;  %v1080_v44 = vld [vmem:[#allocation8 + $0xec] ss:$28 sps:$4 sm:$0xff]   ;;  %v1086_v46 = vld [vmem:[#allocation8 + $0x124] ss:$28 sps:$4 sm:$0xff]   ;;  %v1090_v49 = vld [vmem:[#allocation8 + $0x158] ss:$28 sps:$4 sm:$0xff]  }
  0x58   :  { %v1078_v45 = vld [vmem:[#allocation8 + $0xe8] ss:$28 sps:$4 sm:$0xff]   ;;  %v1084_v47 = vld [vmem:[#allocation8 + $0x120] ss:$28 sps:$4 sm:$0xff]   ;;  %v1098_v50 = vld [vmem:[#allocation8 + $0x194] ss:$28 sps:$4 sm:$0xff]  }
  0x59   :  { %v1096_v51 = vld [vmem:[#allocation8 + $0x190] ss:$28 sps:$4 sm:$0xff]   ;;  %v1101_v52 = vld [vmem:[#allocation8 + $0x1c4] ss:$28 sps:$4 sm:$0xff]   ;;  %v305_v56 = vld [vmem:[#allocation8 + $0x1f8] sm:$0x77] }
  0x5a   :  { %719 = vmatpush1.bf16.msra.mxu0 %v1063_v18  ;;  %v1104_v53 = vld [vmem:[#allocation8 + $0x1cc] ss:$28 sps:$4 sm:$0xff]   ;;  %v1099_v54 = vld [vmem:[#allocation8 + $0x1c0] ss:$28 sps:$4 sm:$0xff]   ;;  %v1010_v58 = vcombine.high %v305_v56, %v305_v56  ;;  %v1009_v60 = vcombine.low %v305_v56, %v305_v56  ;;  %vm692_vm5 = vcmask 1042432   ;;  %v1405_v2 = vshrl.u32 %v152_v1, 7 }
  0x5b   :  { %720 = vmatprep.subr.bf16.mxu0 %v1071_v19  ;;  %v1102_v55 = vld [vmem:[#allocation8 + $0x1c8] ss:$28 sps:$4 sm:$0xff]   ;;  %v1111_v0 = vld [vmem:[#allocation8 + $0x14] ss:$28 sps:$4 sm:$0xff]   ;;  %v150_v4 = vld [vmem:[%s1462_s4] sm:$0x3] }
  0x5c   :  { %v306_v57 = vld [vmem:[#allocation8 + $0x200] sm:$0x77]  ;;  %v694_v62 = vsel %vm692_vm5, %v1009_v60, 0  ;;  %v154_v3 = vsub.s32 0, %v1405_v2  ;;  %v158_v5 = vsub.s32 1, %v1405_v2  ;;  %vm688_vm6 = vcmask 179200  }
  0x5d   :  { %v1012_v59 = vcombine.high %v306_v57, %v306_v57  ;;  %v1011_v61 = vcombine.low %v306_v57, %v306_v57  ;;  %v1109_v18 = vld [vmem:[#allocation8 + $0x10] ss:$28 sps:$4 sm:$0xff]   ;;  %v1112_v19 = vld [vmem:[#allocation8 + $0x18] ss:$28 sps:$4 sm:$0xff]   ;;  %vm918_vm7 = vcmask 130048  }
  0x5e   :  { %721 = vmatpush1.bf16.msra.mxu0 %v1069_v20  ;;  %v155_v6 = vrot.slane %v150_v4, %v154_v3  ;;  %v159_v7 = vrot.slane %v150_v4, %v158_v5 }
  0x5f   :  { %722 = vmatprep.subr.bf16.mxu0 %v1077_v21  ;;  %v700_v63 = vsel %vm692_vm5, %v1011_v61, 0  ;;  %v1115_v21 = vld [vmem:[#allocation8 + $0x4c] ss:$28 sps:$4 sm:$0xff]  }
  0x62   :  { %723 = vmatpush1.bf16.msra.mxu0 %v1075_v22  ;;  %v1113_v22 = vld [vmem:[#allocation8 + $0x48] ss:$28 sps:$4 sm:$0xff]  }
  0x63   :  { %724 = vmatprep.subr.bf16.mxu0 %v1083_v23  ;;  %v1116_v23 = vld [vmem:[#allocation8 + $0x50] ss:$28 sps:$4 sm:$0xff]  }
  0x66   :  { %725 = vmatpush1.bf16.msra.mxu0 %v1081_v24  ;;  %v1119_v24 = vld [vmem:[#allocation8 + $0x84] ss:$28 sps:$4 sm:$0xff]  }
  0x67   :  { %726 = vmatprep.subr.bf16.mxu0 %v1089_v25  ;;  %v1117_v25 = vld [vmem:[#allocation8 + $0x80] ss:$28 sps:$4 sm:$0xff]  }
  0x6a   :  { %727 = vmatpush1.bf16.msra.mxu0 %v1087_v26  ;;  %v1120_v26 = vld [vmem:[#allocation8 + $0x88] ss:$28 sps:$4 sm:$0xff]  }
  0x6b   :  { %728 = vmatprep.subr.bf16.mxu0 %v1095_v27  ;;  %v1123_v27 = vld [vmem:[#allocation8 + $0xbc] ss:$28 sps:$4 sm:$0xff]  }
  0x6e   :  { %729 = vmatpush1.bf16.msra.mxu0 %v1093_v28  ;;  %v1121_v28 = vld [vmem:[#allocation8 + $0xb8] ss:$28 sps:$4 sm:$0xff]  }
  0x6f   :  { %730 = vmatprep.subr.bf16.mxu0 %v1101_v52  ;;  %v309_v52 = vld [vmem:[%s1464_s6] sm:$0x7f]  ;;  %s1307_s6 = smov [#allocation10]  }
  0x70   :  { %s926_s8 = sshll.u32 %s1307_s6, 4  ;;  %s927_s8 = int_to_ptr.vmem [resolvable:$true] %s926_s8 }
  0x71   :  { %s1264_s9 = scalar_lea.vmem %s927_s8, 896  ;;  %p1269_p5 = scmp.lt.s32.totalorder %s927_s8, %s927_s8 }
  0x72   :  { %731 = vmatpush1.bf16.msra.mxu0 %v1099_v54  ;;  %p1265_p4 = scmp.ne.s32.totalorder %s927_s8, %s1264_s9  ;;  %p1270_p6 = scmp.lt.s32.totalorder %s1264_s9, %s1264_s9 }
  0x73   :  { %1016 = vmatprep.subr.msk.bf16.mxu0 %vm692_vm5, %v1010_v58 }
  0x74   :  { %p1271_p7 = por %p1270_p6, %p1269_p5 }
  0x76   :  { %733 = vmatpush1.bf16.msra.mxu0 %v694_v62  ;;  %p1272_p8 = pnand %p1271_p7, %p1265_p4 }
  0x77   :  { %796 = vmatprep.subr.bf16.mxu0 %v1111_v0 }
 0x124   :  { %v139_v30 = vpop.f32.mrb[0].mxu0 }
 0x125   :  { %v140_v31 = vadd.f32 %v937_v29, %v139_v30  ;;  %v1029_v32 = vpop.f32.mrb[1].mxu0  ;;  %v1124_v29 = vld [vmem:[#allocation8 + $0xc0] ss:$28 sps:$4 sm:$0xff]   ;;  %v1127_v30 = vld [vmem:[#allocation8 + $0xf4] ss:$28 sps:$4 sm:$0xff]  }
 0x126   :  { %v142_v33 = vpop.f32.mrb[2].mxu0  ;;  %v1128_v32 = vld [vmem:[#allocation8 + $0xf8] ss:$28 sps:$4 sm:$0xff]  }
 0x127   :  { %v145_v34 = vmax.f32 %v140_v31, 0.0  ;;  %v1030_v35 = vpop.f32.mrb[3].mxu0  ;;  %v1125_v31 = vld [vmem:[#allocation8 + $0xf0] ss:$28 sps:$4 sm:$0xff]  }
 0x128   :  { %v1131_v33 = vld [vmem:[#allocation8 + $0x12c] ss:$28 sps:$4 sm:$0xff]  }
 0x129   :  { %v146_v37 = vpack.c.bf16 %v145_v34, %v145_v34  ;;  %v1129_v34 = vld [vmem:[#allocation8 + $0x128] ss:$28 sps:$4 sm:$0xff]   ;;  %v1132_v35 = vld [vmem:[#allocation8 + $0x130] ss:$28 sps:$4 sm:$0xff]  }
 0x12b   :  { %945 = vmatmul.mubr.msk.bf16.vlgmr.msra.gmra.mrb[0].mxu1 %vm177_vm4, %v146_v37  ;;  %v1133_v37 = vld [vmem:[#allocation8 + $0x160] ss:$28 sps:$4 sm:$0xff]  }
 0x12c   :  { %756 = vmatpush1.bf16.msra.mxu1 %v1054_v36  ;;  %v1135_v36 = vld [vmem:[#allocation8 + $0x164] ss:$28 sps:$4 sm:$0xff]  }
 0x12d   :  { %757 = vmatprep.subr.bf16.mxu1 %v1062_v38  ;;  %v1136_v38 = vld [vmem:[#allocation8 + $0x168] ss:$28 sps:$4 sm:$0xff]  }
 0x130   :  { %758 = vmatpush1.bf16.msra.mxu1 %v1060_v39  ;;  %v1139_v39 = vld [vmem:[#allocation8 + $0x19c] ss:$28 sps:$4 sm:$0xff]  }
 0x131   :  { %759 = vmatprep.subr.bf16.mxu1 %v1068_v40  ;;  %v1137_v40 = vld [vmem:[#allocation8 + $0x198] ss:$28 sps:$4 sm:$0xff]  }
 0x134   :  { %760 = vmatpush1.bf16.msra.mxu1 %v1066_v41  ;;  %v1140_v41 = vld [vmem:[#allocation8 + $0x1a0] ss:$28 sps:$4 sm:$0xff]  }
 0x135   :  { %761 = vmatprep.subr.bf16.mxu1 %v1074_v42  ;;  %v1143_v42 = vld [vmem:[#allocation8 + $0x1d4] ss:$28 sps:$4 sm:$0xff]  }
 0x138   :  { %762 = vmatpush1.bf16.msra.mxu1 %v1072_v43  ;;  %v307_v43 = vld [vmem:[#allocation8 + $0x208] sm:$0x77] }
 0x139   :  { %763 = vmatprep.subr.bf16.mxu1 %v1080_v44  ;;  %v1141_v44 = vld [vmem:[#allocation8 + $0x1d0] ss:$28 sps:$4 sm:$0xff]  }
 0x13c   :  { %764 = vmatpush1.bf16.msra.mxu1 %v1078_v45  ;;  %v1144_v45 = vld [vmem:[#allocation8 + $0x1d8] ss:$28 sps:$4 sm:$0xff]  }
 0x13d   :  { %765 = vmatprep.subr.bf16.mxu1 %v1086_v46  ;;  %v1014_v46 = vcombine.high %v307_v43, %v307_v43 }
 0x140   :  { %766 = vmatpush1.bf16.msra.mxu1 %v1084_v47  ;;  %v1013_v47 = vcombine.low %v307_v43, %v307_v43 }
 0x141   :  { %767 = vmatprep.subr.bf16.mxu1 %v1092_v48  ;;  %v1147_v48 = vld [vmem:[#allocation8 + $0x210] ss:$0 sps:$4 sm:$0x77]  }
 0x144   :  { %768 = vmatpush1.bf16.msra.mxu1 %v1090_v49  ;;  %v706_v49 = vsel %vm692_vm5, %v1013_v47, 0 }
 0x145   :  { %769 = vmatprep.subr.bf16.mxu1 %v1098_v50  ;;  %v712_v50 = vsel %vm692_vm5, %v1147_v48, 0 }
 0x148   :  { %770 = vmatpush1.bf16.msra.mxu1 %v1096_v51  ;;  %v321_v51 = vsub.s32 2, %v1405_v2 }
 0x149   :  { %771 = vmatprep.subr.bf16.mxu1 %v1104_v53  ;;  %v325_v53 = vsub.s32 3, %v1405_v2 }
 0x14a   :  { %v322_v54 = vrot.slane %v309_v52, %v321_v51 }
 0x14b   :  { %v326_v56 = vrot.slane %v309_v52, %v325_v53 }
 0x14c   :  { %772 = vmatpush1.bf16.msra.mxu1 %v1102_v55  ;;  %v318_v55 = vrot.slane %v309_v52, %v158_v5 }
 0x14d   :  { %1018 = vmatprep.subr.msk.bf16.mxu1 %vm692_vm5, %v1012_v59 }
 0x150   :  { %774 = vmatpush1.bf16.msra.mxu1 %v700_v63 }
 0x151   :  { %837 = vmatprep.subr.bf16.mxu1 %v1306_v11 }
 0x1fe   :  { %v222_v8 = vpop.f32.mrb[0].mxu1 }
 0x1ff   :  { %v223_v9 = vadd.f32 %v222_v8, %v155_v6  ;;  %v224_v10 = vpop.f32.mrb[1].mxu1 }
 0x200   :  { %v225_v12 = vadd.f32 %v224_v10, %v159_v7  ;;  %v226_v13 = vpop.f32.mrb[2].mxu1 }
 0x201   :  { %v229_v14 = vmax.f32 %v223_v9, 0.0  ;;  %v227_v15 = vpop.f32.mrb[3].mxu1 }
 0x202   :  { %v230_v16 = vmax.f32 %v225_v12, 0.0 }
 0x203   :  { %v1416_v20 = vpack.c.bf16 %v229_v14, %v229_v14 }
 0x204   :  { %v232_v17 = vpack.c.bf16 %v230_v16, %v230_v16 }
 0x206   :  { %1017 = vmatprep.mubr.msk.bf16.mxu0 %vm688_vm6, %v232_v17  ;;  %1019 = vmatprep.mubr.msk.bf16.mxu1 %vm688_vm6, %v232_v17 }
 0x207   :  { %747 = vmatmul.mubr.bf16.vlgmr.msra.gmra.mrb[4].mxu0 %v1416_v20  ;;  %788 = vmatmul.mubr.bf16.vlgmr.msra.gmra.mrb[4].mxu1 %v1416_v20 }
 0x208   :  { %797 = vmatpush1.bf16.msra.mxu0 %v1109_v18  ;;  %838 = vmatpush1.bf16.msra.mxu1 %v1112_v19 }
 0x209   :  { %1021 = vmatprep.mubr.msk.bf16.mxu0 %vm688_vm6, %v232_v17  ;;  %1022 = vmatprep.mubr.msk.bf16.mxu1 %vm688_vm6, %v232_v17 }
 0x20a   :  { %798 = vmatprep.subr.bf16.mxu0 %v1115_v21  ;;  %839 = vmatprep.subr.bf16.mxu1 %v1306_v11 }
 0x20c   :  { %799 = vmatpush1.bf16.msra.mxu0 %v1113_v22  ;;  %840 = vmatpush1.bf16.msra.mxu1 %v1116_v23 }
 0x20d   :  { %800 = vmatprep.subr.bf16.mxu0 %v1119_v24  ;;  %841 = vmatprep.subr.bf16.mxu1 %v1306_v11 }
 0x210   :  { %801 = vmatpush1.bf16.msra.mxu0 %v1117_v25  ;;  %842 = vmatpush1.bf16.msra.mxu1 %v1120_v26 }
 0x211   :  { %802 = vmatprep.subr.bf16.mxu0 %v1123_v27  ;;  %843 = vmatprep.subr.bf16.mxu1 %v1306_v11  ;;  %v329_v27 = vsub.s32 4, %v1405_v2 }
 0x214   :  { %803 = vmatpush1.bf16.msra.mxu0 %v1121_v28  ;;  %844 = vmatpush1.bf16.msra.mxu1 %v1124_v29  ;;  %v337_v28 = vsub.s32 6, %v1405_v2  ;;  %v333_v29 = vsub.s32 5, %v1405_v2 }
 0x215   :  { %804 = vmatprep.subr.bf16.mxu0 %v1127_v30  ;;  %845 = vmatprep.subr.bf16.mxu1 %v1306_v11  ;;  %v330_v30 = vrot.slane %v309_v52, %v329_v27 }
 0x218   :  { %805 = vmatpush1.bf16.msra.mxu0 %v1125_v31  ;;  %846 = vmatpush1.bf16.msra.mxu1 %v1128_v32  ;;  %v338_v31 = vrot.slane %v309_v52, %v337_v28  ;;  %v334_v32 = vrot.slane %v309_v52, %v333_v29 }
 0x219   :  { %806 = vmatprep.subr.bf16.mxu0 %v1131_v33  ;;  %847 = vmatprep.subr.bf16.mxu1 %v1306_v11 }
 0x21c   :  { %807 = vmatpush1.bf16.msra.mxu0 %v1129_v34  ;;  %848 = vmatpush1.bf16.msra.mxu1 %v1132_v35 }
 0x21d   :  { %808 = vmatprep.subr.bf16.mxu0 %v1135_v36  ;;  %849 = vmatprep.subr.bf16.mxu1 %v1306_v11 }
 0x220   :  { %809 = vmatpush1.bf16.msra.mxu0 %v1133_v37  ;;  %850 = vmatpush1.bf16.msra.mxu1 %v1136_v38 }
 0x221   :  { %810 = vmatprep.subr.bf16.mxu0 %v1139_v39  ;;  %851 = vmatprep.subr.bf16.mxu1 %v1306_v11 }
 0x224   :  { %811 = vmatpush1.bf16.msra.mxu0 %v1137_v40  ;;  %852 = vmatpush1.bf16.msra.mxu1 %v1140_v41 }
 0x225   :  { %812 = vmatprep.subr.bf16.mxu0 %v1143_v42  ;;  %853 = vmatprep.subr.bf16.mxu1 %v1306_v11 }
 0x228   :  { %813 = vmatpush1.bf16.msra.mxu0 %v1141_v44  ;;  %854 = vmatpush1.bf16.msra.mxu1 %v1144_v45 }
 0x229   :  { %1020 = vmatprep.subr.msk.bf16.mxu0 %vm692_vm5, %v1014_v46  ;;  %855 = vmatprep.subr.bf16.mxu1 %v1306_v11  ;;  %v314_v11 = vrot.slane %v309_v52, %v154_v3 }
 0x22c   :  { %815 = vmatpush1.bf16.msra.mxu0 %v706_v49  ;;  %856 = vmatpush1.bf16.msra.mxu1 %v712_v50 }
 0x22f   :  { %829 = vmatmul.mubr.bf16.vlgmr.msra.gmra.mrb[8].mxu0 %v1416_v20  ;;  %870 = vmatmul.mubr.bf16.vlgmr.msra.gmra.mrb[8].mxu1 %v1416_v20 }
 0x2da   :  { %v748_v57 = vpop.f32.mrb[4].mxu0  ;;  %v789_v58 = vpop.f32.mrb[4].mxu1 }
 0x2db   :  { %v749_v59 = vadd.f32 %v748_v57, %v314_v11  ;;  %v790_v60 = vadd.f32 %v789_v58, %v322_v54  ;;  %v750_v61 = vpop.f32.mrb[5].mxu0  ;;  %v791_v62 = vpop.f32.mrb[5].mxu1 }
 0x2dc   :  { %v751_v63 = vadd.f32 %v750_v61, %v318_v55  ;;  %v792_v0 = vadd.f32 %v791_v62, %v326_v56  ;;  %v752_v1 = vpop.f32.mrb[6].mxu0  ;;  %v793_v4 = vpop.f32.mrb[6].mxu1 }
 0x2dd   :  { %v877_v6 = vsub.f32 0.0, %v749_v59  ;;  %v879_v7 = vsub.f32 0.0, %v790_v60  ;;  %v753_v8 = vpop.f32.mrb[7].mxu0  ;;  %v794_v9 = vpop.f32.mrb[7].mxu1 }
 0x2de   :  { %v878_v3 = vsub.f32 0.0, %v751_v63  ;;  %v880_v10 = vsub.f32 0.0, %v792_v0 }
 0x2df   :  { %v884_v12 = vmul.f32 1.442695, %v877_v6  ;;  %v888_v13 = vmul.f32 1.442695, %v879_v7 }
 0x2e0   :  { %v886_v5 = vmul.f32 1.442695, %v878_v3  ;;  %v890_v14 = vmul.f32 1.442695, %v880_v10 }
 0x2e1   :  { %1148 = vpow2.f32 %v884_v12 }
 0x2e2   :  { %1150 = vpow2.f32 %v888_v13 }
 0x2e3   :  { %1152 = vpow2.f32 %v886_v5 }
 0x2e4   :  { %1154 = vpow2.f32 %v890_v14 }
 0x2eb   :  { %v1149_v15 = vpop.eup %1148 }
 0x2ec   :  { %v1151_v16 = vpop.eup %1150  ;;  %v898_v17 = vadd.f32 1.0, %v1149_v15 }
 0x2ed   :  { %v1153_v18 = vpop.eup %1152  ;;  %v900_v19 = vadd.f32 1.0, %v1151_v16 }
 0x2ee   :  { %v1155_v20 = vpop.eup %1154  ;;  %1156 = vrcp.f32 %v898_v17  ;;  %v899_v21 = vadd.f32 1.0, %v1153_v18 }
 0x2ef   :  { %1158 = vrcp.f32 %v900_v19  ;;  %v901_v22 = vadd.f32 1.0, %v1155_v20 }
 0x2f0   :  { %1160 = vrcp.f32 %v899_v21 }
 0x2f1   :  { %1162 = vrcp.f32 %v901_v22 }
 0x2f8   :  { %v1157_v23 = vpop.eup %1156 }
 0x2f9   :  { %v1159_v24 = vpop.eup %1158  ;;  %912 = vst [vmem:[#allocation10] sm:$0xff] %v1157_v23 }
 0x2fa   :  { %v1161_v25 = vpop.eup %1160  ;;  %914 = vst [vmem:[#allocation10 + $0x10] sm:$0xff] %v1159_v24 }
 0x2fb   :  { %v1163_v26 = vpop.eup %1162  ;;  %913 = vst [vmem:[#allocation10 + $0x8] sm:$0xff] %v1161_v25 }
 0x2fc   :  { %915 = vst [vmem:[#allocation10 + $0x18] sm:$0xff] %v1163_v26 }
 0x302   :  { %v830_v33 = vpop.f32.mrb[8].mxu0  ;;  %v871_v34 = vpop.f32.mrb[8].mxu1 }
 0x303   :  { %v831_v35 = vadd.f32 %v830_v33, %v330_v30  ;;  %v872_v36 = vadd.f32 %v871_v34, %v338_v31  ;;  %v832_v37 = vpop.f32.mrb[9].mxu0  ;;  %v873_v38 = vpop.f32.mrb[9].mxu1 }
 0x304   :  { %v833_v39 = vadd.f32 %v832_v37, %v334_v32  ;;  %v834_v40 = vpop.f32.mrb[10].mxu0  ;;  %v874_v41 = vpop.f32.mrb[10].mxu1 }
 0x305   :  { %v881_v42 = vsub.f32 0.0, %v831_v35  ;;  %v883_v43 = vsub.f32 0.0, %v872_v36  ;;  %v835_v44 = vpop.f32.mrb[11].mxu0  ;;  %v875_v45 = vpop.f32.mrb[11].mxu1 }
 0x306   :  { %v882_v46 = vsub.f32 0.0, %v833_v39 }
 0x307   :  { %v892_v47 = vmul.f32 1.442695, %v881_v42  ;;  %v896_v48 = vmul.f32 1.442695, %v883_v43 }
 0x308   :  { %v894_v2 = vmul.f32 1.442695, %v882_v46 }
 0x309   :  { %1164 = vpow2.f32 %v892_v47 }
 0x30a   :  { %1166 = vpow2.f32 %v896_v48 }
 0x30b   :  { %1168 = vpow2.f32 %v894_v2 }
 0x313   :  { %v1165_v49 = vpop.eup %1164 }
 0x314   :  { %v1167_v50 = vpop.eup %1166  ;;  %v902_v51 = vadd.f32 1.0, %v1165_v49 }
 0x315   :  { %v1169_v52 = vpop.eup %1168  ;;  %v904_v53 = vadd.f32 1.0, %v1167_v50 }
 0x316   :  { %1170 = vrcp.f32 %v902_v51  ;;  %v903_v11 = vadd.f32 1.0, %v1169_v52 }
 0x317   :  { %1172 = vrcp.f32 %v904_v53 }
 0x318   :  { %1174 = vrcp.f32 %v903_v11 }
 0x320   :  { %v1171_v54 = vpop.eup %1170 }
 0x321   :  { %v1173_v55 = vpop.eup %1172  ;;  %916 = vst [vmem:[#allocation10 + $0x20] sm:$0xff] %v1171_v54 }
 0x322   :  { %v1175_v56 = vpop.eup %1174  ;;  %919 = vst.msk [vmem:[#allocation10 + $0x30] sm:$0xff] %vm918_vm7, %v1173_v55 }
 0x323   :  { %917 = vst [vmem:[#allocation10 + $0x28] sm:$0xff] %v1175_v56 }
 0x324   :  { %1275 = shalt.err (!%p1272_p8)
}
 0x325   :  { %s1276_s12 = scalar_lea.hbm %s1465_s7, 896 }
 0x326   :  { %p1277_p9 = scmp.ne.s32.totalorder %s1465_s7, %s1276_s12  ;;  %p1280_p10 = scmp.lt.u32.totalorder %s1276_s12, %s1465_s7 }
 0x328   :  { %p1282_p11 = pnand %p1280_p10, %p1277_p9 }
 0x32a   :  { %1285 = shalt.err (!%p1282_p11)
}
 0x32b   :  { %929 = dma.vmem_to_hbm [thread:$0]  %s927_s8, 896, %s1465_s7, [#allocation4]  }
 0x32c   :  { %1292 = dma.done.wait [#allocation4], 896  }
 0x32d   :  { %1293 = vsyncadd [#allocation4], 4294966400 }
 0x32e   :  { %933 = vsyncpa [#allocation3], 1 }
 0x32f   :  { %934 = vsyncpa [#allocation6], 1 }
 0x330   :  { %935 = vsyncpa [#allocation9], 1 }
 0x331   :  { %936 = vsyncpa [#allocation4], 1 }

</bundles_post_ra>
